<compile_context>
chip_gen: v5e
topology: v5e:2x2
jax: 0.10.0
libtpu: 0.0.40
codegen_flags: <defaults>
</compile_context>

<pallas_src>
import functools
import math

import jax
import jax.numpy as jnp
from jax.experimental import pallas as pl
from jax.experimental.pallas import tpu as pltpu


# ---------------------------------------------------------------------------
# Pallas kernel: the full stacked-LSTM layer chain for one batch tile.
# ---------------------------------------------------------------------------
def _stacked_lstm_kernel(*refs, num_layers, hidden_size):
    L, H = num_layers, hidden_size
    idx = 0
    x_ref = refs[idx]; idx += 1          # (B, D)        f32
    h0_ref = refs[idx]; idx += 1         # (L, B, H)     f32
    c0_ref = refs[idx]; idx += 1         # (L, B, H)     f32
    wih0_ref = refs[idx]; idx += 1       # (D, 4H)       bf16
    if L > 1:
        wih_rest_ref = refs[idx]; idx += 1   # (L-1, H, 4H) bf16
    whh_ref = refs[idx]; idx += 1        # (L, H, 4H)    bf16
    b_ref = refs[idx]; idx += 1          # (L, 1, 4H)    f32 (b_ih + b_hh)
    out_ref, hn_ref, cn_ref = refs[idx:idx + 3]

    # ---- hoisted, layer-independent half of the gate pre-activations -------
    # h_0[l] @ W_hh[l] + b[l] depends only on kernel inputs (never on the
    # previous layer's output), so these L MXU matmuls are all issued up
    # front, off the serial input-feeding dependency chain.
    h0_bf = h0_ref[...].astype(jnp.bfloat16)                        # (L, B, H)
    h_gates = []
    for l in range(L):
        h_gates.append(
            jnp.dot(h0_bf[l], whh_ref[l],
                    preferred_element_type=jnp.float32)
            + b_ref[l])                                             # (B, 4H) f32

    # ---- serial layer chain (input feeding) ---------------------------------
    x = x_ref[...]                                                  # (B, D) f32
    for l in range(L):
        w = wih0_ref[...] if l == 0 else wih_rest_ref[l - 1]
        gates = (jnp.dot(x.astype(jnp.bfloat16), w,
                         preferred_element_type=jnp.float32)
                 + h_gates[l])                                      # (B, 4H)

        # PyTorch LSTMCell gate order: i, f, g, o.  Elementwise math in f32.
        sig_if = jax.nn.sigmoid(gates[:, :2 * H])   # i, f are contiguous
        i_g = sig_if[:, :H]
        f_g = sig_if[:, H:]
        g_g = jnp.tanh(gates[:, 2 * H:3 * H])
        o_g = jax.nn.sigmoid(gates[:, 3 * H:])

        c_new = f_g * c0_ref[l] + i_g * g_g
        h_new = o_g * jnp.tanh(c_new)

        hn_ref[l] = h_new                  # written exactly once per layer
        cn_ref[l] = c_new
        x = h_new                          # dropout(p=0.0) between layers == id

    out_ref[...] = x                       # output of the top layer


# ---------------------------------------------------------------------------
# Wrapper: weight prep (transpose + bf16 cast, bias fold, stacking) and
# pallas_call.
# ---------------------------------------------------------------------------
def stacked_lstm_forward(x, h0, c0, w_ih, w_hh, b_ih, b_hh, *, batch_tile=None):
    """StackedLSTM forward.

    x:    (B, input_size) f32
    h0/c0:(L, B, H) f32
    w_ih: list of L arrays (4H, in_dim_l)   (in_dim_0 = input_size, else H)
    w_hh: list of L arrays (4H, H)
    b_ih/b_hh: lists of L arrays (4H,)
    """
    B, D = x.shape
    L, _, H = h0.shape
    if batch_tile is None:
        batch_tile = B          # set smaller (multiple of 8) to split batch
    assert B % batch_tile == 0  # across v7x TensorCores via the parallel axis

    # Pre-transpose to (in, 4H) so the kernel computes x @ W on the MXU, cast
    # to bf16 (MXU-native), stack per-layer weights into contiguous slabs, and
    # fold the two biases into one f32 row per layer.
    wih0 = jnp.asarray(w_ih[0].T, jnp.bfloat16)                       # (D, 4H)
    whh = jnp.stack([jnp.asarray(w.T, jnp.bfloat16) for w in w_hh])   # (L, H, 4H)
    bias = jnp.stack([jnp.asarray((bi + bh).reshape(1, 4 * H), jnp.float32)
                      for bi, bh in zip(b_ih, b_hh)])                 # (L, 1, 4H)

    rep2 = lambda b: (0, 0)            # replicated 2-D weight slab
    rep3 = lambda b: (0, 0, 0)         # replicated 3-D weight slab

    args = [x, h0, c0, wih0]
    in_specs = [
        pl.BlockSpec((batch_tile, D), lambda b: (b, 0)),              # x
        pl.BlockSpec((L, batch_tile, H), lambda b: (0, b, 0)),        # h_0
        pl.BlockSpec((L, batch_tile, H), lambda b: (0, b, 0)),        # c_0
        pl.BlockSpec((D, 4 * H), rep2),                               # W_ih[0]
    ]
    if L > 1:
        wih_rest = jnp.stack(
            [jnp.asarray(w.T, jnp.bfloat16) for w in w_ih[1:]])       # (L-1, H, 4H)
        args.append(wih_rest)
        in_specs.append(pl.BlockSpec((L - 1, H, 4 * H), rep3))
    args += [whh, bias]
    in_specs += [
        pl.BlockSpec((L, H, 4 * H), rep3),                            # W_hh
        pl.BlockSpec((L, 1, 4 * H), rep3),                            # bias
    ]

    out_specs = [
        pl.BlockSpec((batch_tile, H), lambda b: (b, 0)),              # output
        pl.BlockSpec((L, batch_tile, H), lambda b: (0, b, 0)),        # h_1
        pl.BlockSpec((L, batch_tile, H), lambda b: (0, b, 0)),        # c_1
    ]

    grid_spec = pltpu.PrefetchScalarGridSpec(
        num_scalar_prefetch=0,
        grid=(B // batch_tile,),
        in_specs=in_specs,
        out_specs=out_specs,
    )

    out, h1, c1 = pl.pallas_call(
        functools.partial(_stacked_lstm_kernel, num_layers=L, hidden_size=H),
        out_shape=(
            jax.ShapeDtypeStruct((B, H), jnp.float32),
            jax.ShapeDtypeStruct((L, B, H), jnp.float32),
            jax.ShapeDtypeStruct((L, B, H), jnp.float32),
        ),
        grid_spec=grid_spec,
        compiler_params=pltpu.CompilerParams(
            dimension_semantics=("parallel",)),   # batch tiles are independent
    )(*args)

    return out, (h1, c1)


# ---------------------------------------------------------------------------
# Pure-JAX reference (exact f32 port of the PyTorch module).
# ---------------------------------------------------------------------------
def ref_forward(x, h0, c0, w_ih, w_hh, b_ih, b_hh):
    L = h0.shape[0]
    h1, c1 = [], []
    inp = x
    for l in range(L):
        g = inp @ w_ih[l].T + b_ih[l] + h0[l] @ w_hh[l].T + b_hh[l]
        i_g, f_g, g_g, o_g = jnp.split(g, 4, axis=-1)
        c = jax.nn.sigmoid(f_g) * c0[l] + jax.nn.sigmoid(i_g) * jnp.tanh(g_g)
        h = jax.nn.sigmoid(o_g) * jnp.tanh(c)
        h1.append(h)
        c1.append(c)
        inp = h                      # dropout p=0.0 -> identity
    return inp, (jnp.stack(h1), jnp.stack(c1))


if __name__ == "__main__":
    # Small, module-consistent shapes: num_layers=2, batch=8,
    # input_size=64 (e.g. word_vec + rnn for input feeding), rnn_size=32,
    # dropout=0.0 (identity; training-mode dropout not modeled).
    L, B, D, H = 2, 8, 64, 32

    key = jax.random.PRNGKey(0)
    keys = jax.random.split(key, 3 + 4 * L)
    k_x, k_h0, k_c0 = keys[0], keys[1], keys[2]
    k_params = keys[3:]

    x = 0.5 * jax.random.normal(k_x, (B, D), jnp.float32)
    h0 = 0.5 * jax.random.normal(k_h0, (L, B, H), jnp.float32)
    c0 = 0.5 * jax.random.normal(k_c0, (L, B, H), jnp.float32)

    # Deterministic parameter init, shapes per nn.LSTMCell.
    s = 1.0 / math.sqrt(H)
    w_ih, w_hh, b_ih, b_hh = [], [], [], []
    for l in range(L):
        in_dim = D if l == 0 else H
        k0, k1, k2, k3 = jax.random.split(k_params[l], 4)
        w_ih.append(jax.random.uniform(k0, (4 * H, in_dim), jnp.float32, -s, s))
        w_hh.append(jax.random.uniform(k1, (4 * H, H), jnp.float32, -s, s))
        b_ih.append(jax.random.uniform(k2, (4 * H,), jnp.float32, -s, s))
        b_hh.append(jax.random.uniform(k3, (4 * H,), jnp.float32, -s, s))

    fwd = jax.jit(stacked_lstm_forward)
    out, (h1, c1) = fwd(x, h0, c0, w_ih, w_hh, b_ih, b_hh)
    jax.block_until_ready((out, h1, c1))

    out_r, (h1_r, c1_r) = ref_forward(x, h0, c0, w_ih, w_hh, b_ih, b_hh)

    assert out.shape == (B, H) and h1.shape == (L, B, H) and c1.shape == (L, B, H)
    # bf16 MXU matmuls (f32 accumulation) -> loosened tolerance vs f32 ref.
    assert jnp.allclose(out, out_r, rtol=2e-2, atol=2e-2)
    assert jnp.allclose(h1, h1_r, rtol=2e-2, atol=2e-2)
    assert jnp.allclose(c1, c1_r, rtol=2e-2, atol=2e-2)

    # TODO(synk): training-mode dropout between layers (random mask) is not
    # implemented; p=0.0 / eval-mode identity is used, matching inference.
    print("KERNEL_OK")
</pallas_src>

<mosaic_0001>
module attributes {stable_mosaic.version = 11 : i64} {
  func.func @_stacked_lstm_kernel(%arg0: i32, %arg1: memref<8x64xf32, #tpu.memory_space<vmem>>, %arg2: memref<2x8x32xf32, #tpu.memory_space<vmem>>, %arg3: memref<2x8x32xf32, #tpu.memory_space<vmem>>, %arg4: memref<64x128xbf16, #tpu.memory_space<vmem>>, %arg5: memref<1x32x128xbf16, #tpu.memory_space<vmem>>, %arg6: memref<2x32x128xbf16, #tpu.memory_space<vmem>>, %arg7: memref<2x1x128xf32, #tpu.memory_space<vmem>>, %arg8: memref<8x32xf32, #tpu.memory_space<vmem>>, %arg9: memref<2x8x32xf32, #tpu.memory_space<vmem>>, %arg10: memref<2x8x32xf32, #tpu.memory_space<vmem>>) attributes {dimension_semantics = [#tpu.dimension_semantics<parallel>], iteration_bounds = array<i64: 1>, scalar_prefetch = 0 : i64, scratch_operands = 0 : i64, tpu.core_type = #tpu.core_type<tc>, window_params = [{transform_indices = @transform_0, window_bounds = array<i64: 8, 64>}, {transform_indices = @transform_1, window_bounds = array<i64: 2, 8, 32>}, {transform_indices = @transform_2, window_bounds = array<i64: 2, 8, 32>}, {pipeline_mode = #tpu.pipeline_mode<synchronous>, transform_indices = @transform_3, window_bounds = array<i64: 64, 128>}, {pipeline_mode = #tpu.pipeline_mode<synchronous>, transform_indices = @transform_4, window_bounds = array<i64: 1, 32, 128>}, {pipeline_mode = #tpu.pipeline_mode<synchronous>, transform_indices = @transform_5, window_bounds = array<i64: 2, 32, 128>}, {pipeline_mode = #tpu.pipeline_mode<synchronous>, transform_indices = @transform_6, window_bounds = array<i64: 2, 1, 128>}, {transform_indices = @transform_7, window_bounds = array<i64: 8, 32>}, {transform_indices = @transform_8, window_bounds = array<i64: 2, 8, 32>}, {transform_indices = @transform_9, window_bounds = array<i64: 2, 8, 32>}]} {
    %c0 = arith.constant 0 : index
    %c0_0 = arith.constant 0 : index
    %c0_1 = arith.constant 0 : index
    %0 = vector.load %arg2[%c0, %c0_0, %c0_1] : memref<2x8x32xf32, #tpu.memory_space<vmem>>, vector<2x8x32xf32>
    %1 = arith.truncf %0 : vector<2x8x32xf32> to vector<2x8x32xbf16>
    %2 = vector.extract_strided_slice %1 {offsets = [0, 0, 0], sizes = [1, 8, 32], strides = [1, 1, 1]} : vector<2x8x32xbf16> to vector<1x8x32xbf16>
    %3 = vector.shape_cast %2 : vector<1x8x32xbf16> to vector<8x32xbf16>
    %c0_2 = arith.constant 0 : index
    %c0_3 = arith.constant 0 : index
    %c0_4 = arith.constant 0 : index
    %4 = vector.load %arg6[%c0_2, %c0_3, %c0_4] : memref<2x32x128xbf16, #tpu.memory_space<vmem>>, vector<1x32x128xbf16>
    %5 = vector.shape_cast %4 : vector<1x32x128xbf16> to vector<32x128xbf16>
    %cst = arith.constant dense<0.000000e+00> : vector<8x128xf32>
    %6 = tpu.matmul %3, %5, %cst {dimension_numbers = #tpu.dot_dimension_numbers<[1], [0], [0], [1], [0, 0, 1, 1], [], []>} : vector<8x32xbf16>, vector<32x128xbf16>, vector<8x128xf32> -> vector<8x128xf32>
    %c0_5 = arith.constant 0 : index
    %c0_6 = arith.constant 0 : index
    %c0_7 = arith.constant 0 : index
    %7 = vector.load %arg7[%c0_5, %c0_6, %c0_7] : memref<2x1x128xf32, #tpu.memory_space<vmem>>, vector<1x1x128xf32>
    %8 = vector.shape_cast %7 : vector<1x1x128xf32> to vector<1x128xf32>
    %9 = vector.broadcast %8 : vector<1x128xf32> to vector<8x128xf32>
    %10 = arith.addf %6, %9 : vector<8x128xf32>
    %11 = vector.extract_strided_slice %1 {offsets = [1, 0, 0], sizes = [1, 8, 32], strides = [1, 1, 1]} : vector<2x8x32xbf16> to vector<1x8x32xbf16>
    %12 = vector.shape_cast %11 : vector<1x8x32xbf16> to vector<8x32xbf16>
    %c1 = arith.constant 1 : index
    %c0_8 = arith.constant 0 : index
    %c0_9 = arith.constant 0 : index
    %13 = vector.load %arg6[%c1, %c0_8, %c0_9] : memref<2x32x128xbf16, #tpu.memory_space<vmem>>, vector<1x32x128xbf16>
    %14 = vector.shape_cast %13 : vector<1x32x128xbf16> to vector<32x128xbf16>
    %cst_10 = arith.constant dense<0.000000e+00> : vector<8x128xf32>
    %15 = tpu.matmul %12, %14, %cst_10 {dimension_numbers = #tpu.dot_dimension_numbers<[1], [0], [0], [1], [0, 0, 1, 1], [], []>} : vector<8x32xbf16>, vector<32x128xbf16>, vector<8x128xf32> -> vector<8x128xf32>
    %c1_11 = arith.constant 1 : index
    %c0_12 = arith.constant 0 : index
    %c0_13 = arith.constant 0 : index
    %16 = vector.load %arg7[%c1_11, %c0_12, %c0_13] : memref<2x1x128xf32, #tpu.memory_space<vmem>>, vector<1x1x128xf32>
    %17 = vector.shape_cast %16 : vector<1x1x128xf32> to vector<1x128xf32>
    %18 = vector.broadcast %17 : vector<1x128xf32> to vector<8x128xf32>
    %19 = arith.addf %15, %18 : vector<8x128xf32>
    %c0_14 = arith.constant 0 : index
    %c0_15 = arith.constant 0 : index
    %20 = vector.load %arg1[%c0_14, %c0_15] : memref<8x64xf32, #tpu.memory_space<vmem>>, vector<8x64xf32>
    %c0_16 = arith.constant 0 : index
    %c0_17 = arith.constant 0 : index
    %21 = vector.load %arg4[%c0_16, %c0_17] : memref<64x128xbf16, #tpu.memory_space<vmem>>, vector<64x128xbf16>
    %22 = arith.truncf %20 : vector<8x64xf32> to vector<8x64xbf16>
    %cst_18 = arith.constant dense<0.000000e+00> : vector<8x128xf32>
    %23 = tpu.matmul %22, %21, %cst_18 {dimension_numbers = #tpu.dot_dimension_numbers<[1], [0], [0], [1], [0, 0, 1, 1], [], []>} : vector<8x64xbf16>, vector<64x128xbf16>, vector<8x128xf32> -> vector<8x128xf32>
    %24 = arith.addf %23, %10 : vector<8x128xf32>
    %25 = vector.extract_strided_slice %24 {offsets = [0, 0], sizes = [8, 64], strides = [1, 1]} : vector<8x128xf32> to vector<8x64xf32>
    %26 = arith.negf %25 : vector<8x64xf32>
    %27 = math.exp %26 : vector<8x64xf32>
    %cst_19 = arith.constant 1.000000e+00 : f32
    %28 = vector.broadcast %cst_19 : f32 to vector<8x64xf32>
    %29 = arith.addf %28, %27 : vector<8x64xf32>
    %30 = arith.divf %28, %29 : vector<8x64xf32>
    %31 = vector.extract_strided_slice %30 {offsets = [0, 0], sizes = [8, 32], strides = [1, 1]} : vector<8x64xf32> to vector<8x32xf32>
    %32 = vector.extract_strided_slice %30 {offsets = [0, 32], sizes = [8, 32], strides = [1, 1]} : vector<8x64xf32> to vector<8x32xf32>
    %33 = vector.extract_strided_slice %24 {offsets = [0, 64], sizes = [8, 32], strides = [1, 1]} : vector<8x128xf32> to vector<8x32xf32>
    %34 = math.tanh %33 : vector<8x32xf32>
    %35 = vector.extract_strided_slice %24 {offsets = [0, 96], sizes = [8, 32], strides = [1, 1]} : vector<8x128xf32> to vector<8x32xf32>
    %36 = arith.negf %35 : vector<8x32xf32>
    %37 = math.exp %36 : vector<8x32xf32>
    %cst_20 = arith.constant 1.000000e+00 : f32
    %38 = vector.broadcast %cst_20 : f32 to vector<8x32xf32>
    %39 = arith.addf %38, %37 : vector<8x32xf32>
    %40 = arith.divf %38, %39 : vector<8x32xf32>
    %c0_21 = arith.constant 0 : index
    %c0_22 = arith.constant 0 : index
    %c0_23 = arith.constant 0 : index
    %41 = vector.load %arg3[%c0_21, %c0_22, %c0_23] : memref<2x8x32xf32, #tpu.memory_space<vmem>>, vector<1x8x32xf32>
    %42 = vector.shape_cast %41 : vector<1x8x32xf32> to vector<8x32xf32>
    %43 = arith.mulf %32, %42 : vector<8x32xf32>
    %44 = arith.mulf %31, %34 : vector<8x32xf32>
    %45 = arith.addf %43, %44 : vector<8x32xf32>
    %46 = math.tanh %45 : vector<8x32xf32>
    %47 = arith.mulf %40, %46 : vector<8x32xf32>
    %c0_24 = arith.constant 0 : index
    %c0_25 = arith.constant 0 : index
    %c0_26 = arith.constant 0 : index
    %48 = vector.load %arg9[%c0_24, %c0_25, %c0_26] : memref<2x8x32xf32, #tpu.memory_space<vmem>>, vector<1x8x32xf32>
    %49 = vector.shape_cast %48 : vector<1x8x32xf32> to vector<8x32xf32>
    %50 = vector.shape_cast %47 : vector<8x32xf32> to vector<1x8x32xf32>
    tpu.vector_store %arg9[%c0_24, %c0_25, %c0_26], %50 {strides = array<i32>} : memref<2x8x32xf32, #tpu.memory_space<vmem>>, vector<1x8x32xf32>,
    %c0_27 = arith.constant 0 : index
    %c0_28 = arith.constant 0 : index
    %c0_29 = arith.constant 0 : index
    %51 = vector.load %arg10[%c0_27, %c0_28, %c0_29] : memref<2x8x32xf32, #tpu.memory_space<vmem>>, vector<1x8x32xf32>
    %52 = vector.shape_cast %51 : vector<1x8x32xf32> to vector<8x32xf32>
    %53 = vector.shape_cast %45 : vector<8x32xf32> to vector<1x8x32xf32>
    tpu.vector_store %arg10[%c0_27, %c0_28, %c0_29], %53 {strides = array<i32>} : memref<2x8x32xf32, #tpu.memory_space<vmem>>, vector<1x8x32xf32>,
    %c0_30 = arith.constant 0 : index
    %c0_31 = arith.constant 0 : index
    %c0_32 = arith.constant 0 : index
    %54 = vector.load %arg5[%c0_30, %c0_31, %c0_32] : memref<1x32x128xbf16, #tpu.memory_space<vmem>>, vector<1x32x128xbf16>
    %55 = vector.shape_cast %54 : vector<1x32x128xbf16> to vector<32x128xbf16>
    %56 = arith.truncf %47 : vector<8x32xf32> to vector<8x32xbf16>
    %cst_33 = arith.constant dense<0.000000e+00> : vector<8x128xf32>
    %57 = tpu.matmul %56, %55, %cst_33 {dimension_numbers = #tpu.dot_dimension_numbers<[1], [0], [0], [1], [0, 0, 1, 1], [], []>} : vector<8x32xbf16>, vector<32x128xbf16>, vector<8x128xf32> -> vector<8x128xf32>
    %58 = arith.addf %57, %19 : vector<8x128xf32>
    %59 = vector.extract_strided_slice %58 {offsets = [0, 0], sizes = [8, 64], strides = [1, 1]} : vector<8x128xf32> to vector<8x64xf32>
    %60 = arith.negf %59 : vector<8x64xf32>
    %61 = math.exp %60 : vector<8x64xf32>
    %cst_34 = arith.constant 1.000000e+00 : f32
    %62 = vector.broadcast %cst_34 : f32 to vector<8x64xf32>
    %63 = arith.addf %62, %61 : vector<8x64xf32>
    %64 = arith.divf %62, %63 : vector<8x64xf32>
    %65 = vector.extract_strided_slice %64 {offsets = [0, 0], sizes = [8, 32], strides = [1, 1]} : vector<8x64xf32> to vector<8x32xf32>
    %66 = vector.extract_strided_slice %64 {offsets = [0, 32], sizes = [8, 32], strides = [1, 1]} : vector<8x64xf32> to vector<8x32xf32>
    %67 = vector.extract_strided_slice %58 {offsets = [0, 64], sizes = [8, 32], strides = [1, 1]} : vector<8x128xf32> to vector<8x32xf32>
    %68 = math.tanh %67 : vector<8x32xf32>
    %69 = vector.extract_strided_slice %58 {offsets = [0, 96], sizes = [8, 32], strides = [1, 1]} : vector<8x128xf32> to vector<8x32xf32>
    %70 = arith.negf %69 : vector<8x32xf32>
    %71 = math.exp %70 : vector<8x32xf32>
    %cst_35 = arith.constant 1.000000e+00 : f32
    %72 = vector.broadcast %cst_35 : f32 to vector<8x32xf32>
    %73 = arith.addf %72, %71 : vector<8x32xf32>
    %74 = arith.divf %72, %73 : vector<8x32xf32>
    %c1_36 = arith.constant 1 : index
    %c0_37 = arith.constant 0 : index
    %c0_38 = arith.constant 0 : index
    %75 = vector.load %arg3[%c1_36, %c0_37, %c0_38] : memref<2x8x32xf32, #tpu.memory_space<vmem>>, vector<1x8x32xf32>
    %76 = vector.shape_cast %75 : vector<1x8x32xf32> to vector<8x32xf32>
    %77 = arith.mulf %66, %76 : vector<8x32xf32>
    %78 = arith.mulf %65, %68 : vector<8x32xf32>
    %79 = arith.addf %77, %78 : vector<8x32xf32>
    %80 = math.tanh %79 : vector<8x32xf32>
    %81 = arith.mulf %74, %80 : vector<8x32xf32>
    %c1_39 = arith.constant 1 : index
    %c0_40 = arith.constant 0 : index
    %c0_41 = arith.constant 0 : index
    %82 = vector.load %arg9[%c1_39, %c0_40, %c0_41] : memref<2x8x32xf32, #tpu.memory_space<vmem>>, vector<1x8x32xf32>
    %83 = vector.shape_cast %82 : vector<1x8x32xf32> to vector<8x32xf32>
    %84 = vector.shape_cast %81 : vector<8x32xf32> to vector<1x8x32xf32>
    tpu.vector_store %arg9[%c1_39, %c0_40, %c0_41], %84 {strides = array<i32>} : memref<2x8x32xf32, #tpu.memory_space<vmem>>, vector<1x8x32xf32>,
    %c1_42 = arith.constant 1 : index
    %c0_43 = arith.constant 0 : index
    %c0_44 = arith.constant 0 : index
    %85 = vector.load %arg10[%c1_42, %c0_43, %c0_44] : memref<2x8x32xf32, #tpu.memory_space<vmem>>, vector<1x8x32xf32>
    %86 = vector.shape_cast %85 : vector<1x8x32xf32> to vector<8x32xf32>
    %87 = vector.shape_cast %79 : vector<8x32xf32> to vector<1x8x32xf32>
    tpu.vector_store %arg10[%c1_42, %c0_43, %c0_44], %87 {strides = array<i32>} : memref<2x8x32xf32, #tpu.memory_space<vmem>>, vector<1x8x32xf32>,
    %c0_45 = arith.constant 0 : index
    %c0_46 = arith.constant 0 : index
    %88 = vector.load %arg8[%c0_45, %c0_46] : memref<8x32xf32, #tpu.memory_space<vmem>>, vector<8x32xf32>
    tpu.vector_store %arg8[%c0_45, %c0_46], %81 {strides = array<i32>} : memref<8x32xf32, #tpu.memory_space<vmem>>, vector<8x32xf32>,
    return
  }
  func.func @transform_0(%arg0: i32) -> (i32, i32) {
    %c0_i32 = arith.constant 0 : i32
    %c0_i32_0 = arith.constant 0 : i32
    return %arg0, %c0_i32 : i32, i32
  }
  func.func @transform_1(%arg0: i32) -> (i32, i32, i32) {
    %c0_i32 = arith.constant 0 : i32
    %c0_i32_0 = arith.constant 0 : i32
    %c0_i32_1 = arith.constant 0 : i32
    return %c0_i32, %arg0, %c0_i32_0 : i32, i32, i32
  }
  func.func @transform_2(%arg0: i32) -> (i32, i32, i32) {
    %c0_i32 = arith.constant 0 : i32
    %c0_i32_0 = arith.constant 0 : i32
    %c0_i32_1 = arith.constant 0 : i32
    return %c0_i32, %arg0, %c0_i32_0 : i32, i32, i32
  }
  func.func @transform_3(%arg0: i32) -> (i32, i32) {
    %c0_i32 = arith.constant 0 : i32
    %c0_i32_0 = arith.constant 0 : i32
    %c0_i32_1 = arith.constant 0 : i32
    return %c0_i32, %c0_i32_0 : i32, i32
  }
  func.func @transform_4(%arg0: i32) -> (i32, i32, i32) {
    %c0_i32 = arith.constant 0 : i32
    %c0_i32_0 = arith.constant 0 : i32
    %c0_i32_1 = arith.constant 0 : i32
    %c0_i32_2 = arith.constant 0 : i32
    return %c0_i32, %c0_i32_0, %c0_i32_1 : i32, i32, i32
  }
  func.func @transform_5(%arg0: i32) -> (i32, i32, i32) {
    %c0_i32 = arith.constant 0 : i32
    %c0_i32_0 = arith.constant 0 : i32
    %c0_i32_1 = arith.constant 0 : i32
    %c0_i32_2 = arith.constant 0 : i32
    return %c0_i32, %c0_i32_0, %c0_i32_1 : i32, i32, i32
  }
  func.func @transform_6(%arg0: i32) -> (i32, i32, i32) {
    %c0_i32 = arith.constant 0 : i32
    %c0_i32_0 = arith.constant 0 : i32
    %c0_i32_1 = arith.constant 0 : i32
    %c0_i32_2 = arith.constant 0 : i32
    return %c0_i32, %c0_i32_0, %c0_i32_1 : i32, i32, i32
  }
  func.func @transform_7(%arg0: i32) -> (i32, i32) {
    %c0_i32 = arith.constant 0 : i32
    %c0_i32_0 = arith.constant 0 : i32
    return %arg0, %c0_i32 : i32, i32
  }
  func.func @transform_8(%arg0: i32) -> (i32, i32, i32) {
    %c0_i32 = arith.constant 0 : i32
    %c0_i32_0 = arith.constant 0 : i32
    %c0_i32_1 = arith.constant 0 : i32
    return %c0_i32, %arg0, %c0_i32_0 : i32, i32, i32
  }
  func.func @transform_9(%arg0: i32) -> (i32, i32, i32) {
    %c0_i32 = arith.constant 0 : i32
    %c0_i32_0 = arith.constant 0 : i32
    %c0_i32_1 = arith.constant 0 : i32
    return %c0_i32, %arg0, %c0_i32_0 : i32, i32, i32
  }
}

</mosaic_0001>

<bundles_post_ra>
// kernel: stacked_lstm_forward.1
= control target key start
LH: loop header
LB: loop body
LE: loop exit
PB: predicated region body
PF: predicated region fallthrough
CT: control target
= control target key end

     0   :  { %15 = vsyncpa [#allocation3], 0  ;;  %s662_s0 = inlined_call_operand.vmem [shape: f32[8,64], index: 0, kind: input, shape index: {}]   ;;  %s663_s1 = inlined_call_operand.vmem [shape: f32[2,8,32], index: 1, kind: input, shape index: {}]   ;;  %s664_s2 = inlined_call_operand.vmem [shape: f32[2,8,32], index: 2, kind: input, shape index: {}]   ;;  %s665_s3 = inlined_call_operand.vmem [shape: bf16[64,128], index: 3, kind: input, shape index: {}]   ;;  %s666_s4 = inlined_call_operand.vmem [shape: bf16[1,32,128], index: 4, kind: input, shape index: {}]   ;;  %s667_s5 = inlined_call_operand.vmem [shape: bf16[2,32,128], index: 5, kind: input, shape index: {}]   ;;  %s668_s6 = inlined_call_operand.vmem [shape: f32[2,1,128], index: 6, kind: input, shape index: {}]   ;;  %s669_s7 = inlined_call_operand.hbm [shape: f32[8,32], index: 7, kind: output, shape index: {0}]   ;;  %s670_s8 = inlined_call_operand.hbm [shape: f32[2,8,32], index: 8, kind: output, shape index: {1}]   ;;  %s671_s9 = inlined_call_operand.hbm [shape: f32[2,8,32], index: 9, kind: output, shape index: {2}]  }
   0x1   :  { %v416_v0 = vld [vmem:[%s665_s3 + $0x18] sm:$0xff]  ;;  %v410_v1 = vld [vmem:[%s667_s5 + $0x8] sm:$0xff]  ;;  %v415_v2 = vld [vmem:[%s665_s3 + $0x10] sm:$0xff] }
   0x2   :  { %153 = vmatpush.bf16.msra.mxu2 %v416_v0  ;;  %66 = vmatpush.bf16.msra.mxu0 %v410_v1  ;;  %v409_v3 = vld [vmem:[%s667_s5] sm:$0xff] }
   0x3   :  { %v32_v4 = vld [vmem:[%s663_s1] sm:$0xff] }
   0x4   :  { %16 = vsyncpa [#allocation5], 0  ;;  %v34_v5 = vpack.c.bf16 %v32_v4, %v32_v4  ;;  %v414_v6 = vld [vmem:[%s665_s3 + $0x8] sm:$0xff]  ;;  %vm56_vm0 = vcmask 261120   ;;  %v413_v7 = vld [vmem:[%s665_s3] sm:$0xff]  ;;  %vm145_vm1 = vcmask 523264  }
   0x5   :  { %v111_v8 = vld [vmem:[%s662_s0] sm:$0xff]  ;;  %s521_s3 = smov 64   ;;  %s522_s28 = smov 32   ;;  %v408_v34 = vld [vmem:[%s664_s2 + $0x8] sm:$0xff]  ;;  %v412_v40 = vld [vmem:[%s667_s5 + $0x18] sm:$0xff] }
   0x6   :  { %154 = vmatpush.bf16.msra.mxu2 %v415_v2  ;;  %67 = vmatpush.bf16.msra.mxu0 %v409_v3  ;;  %v120_v9 = vpack.c.bf16 %v111_v8, %v111_v8  ;;  %v427_v11 = vld [vmem:[%s668_s6] ss:$0 sm:$0xff]  ;;  %v418_v41 = vld [vmem:[%s666_s4 + $0x8] sm:$0xff]  ;;  %v411_v42 = vld [vmem:[%s667_s5 + $0x10] sm:$0xff]  ;;  %s523_s5 = smov 96   ;;  %s323_s22 = sshll.u32 %s670_s8, 4  ;;  %s324_s22 = int_to_ptr.hbm [resolvable:$true] %s323_s22 }
   0x7   :  { %v182_v18 = vld [vmem:[%s664_s2] sm:$0xff]  ;;  %104 = vmatpush.bf16.msra.mxu1 %v412_v40  ;;  %243 = vmatpush.bf16.msra.mxu3 %v418_v41  ;;  %v33_v43 = vld [vmem:[%s663_s1 + $0x8] sm:$0xff]  ;;  %s525_s23 = smov [#allocation2]   ;;  %s526_s0 = smov [#allocation6]  }
   0x8   :  { %v417_v44 = vld [vmem:[%s666_s4] sm:$0xff]  ;;  %v35_v45 = vpack.c.bf16 %v33_v43, %v33_v43  ;;  %s311_s24 = sshll.u32 %s525_s23, 4  ;;  %s334_s27 = sshll.u32 %s526_s0, 4  ;;  %s312_s24 = int_to_ptr.vmem [resolvable:$true] %s311_s24  ;;  %s335_s27 = int_to_ptr.vmem [resolvable:$true] %s334_s27 }
   0x9   :  { %365 = vmatmul.msk.bf16.vlgmr.msra.gmra.mxu0 %vm56_vm0, %v34_v5  ;;  %v428_v54 = vld [vmem:[%s668_s6 + $0x1] ss:$0 sm:$0xff]  ;;  %s524_s6 = smov [#allocation4]   ;;  %s336_s30 = sshll.u32 %s671_s9, 4  ;;  %s337_s30 = int_to_ptr.hbm [resolvable:$true] %s336_s30 }
   0xa   :  { %155 = vmatpush.bf16.msra.mxu2 %v414_v6  ;;  %s321_s19 = sshll.u32 %s524_s6, 4  ;;  %s527_s8 = smov 128   ;;  %s322_s19 = int_to_ptr.vmem [resolvable:$true] %s321_s19 }
   0xb   :  { %105 = vmatpush.bf16.msra.mxu1 %v411_v42  ;;  %244 = vmatpush.bf16.msra.mxu3 %v417_v44  ;;  %s528_s10 = smov 8  }
   0xe   :  { %156 = vmatpush.bf16.msra.mxu2 %v413_v7  ;;  %379 = vmatmul.msk.bf16.vlgmr.msra.gmra.mxu1 %vm56_vm0, %v35_v45 }
  0x11   :  { %396 = vmatmul.msk.bf16.vlgmr.msra.gmra.mxu2 %vm145_vm1, %v120_v9 }
  0x86   :  { %v69_v10 = vpop.f32.mrf.mxu0 }
  0x87   :  { %v70_v13 = vadd.f32 %v427_v11, %v69_v10 }
  0x8b   :  { %v107_v51 = vpop.f32.mrf.mxu1 }
  0x8c   :  { %v108_v55 = vadd.f32 %v428_v54, %v107_v51 }
  0x8e   :  { %v71_v12 = vpop.f32.mrf.mxu0 }
  0x93   :  { %v109_v52 = vpop.f32.mrf.mxu1 }
  0x94   :  { %v158_v14 = vpop.f32.mrf.mxu2 }
  0x95   :  { %v159_v15 = vadd.f32 %v158_v14, %v70_v13 }
  0x97   :  { %429 = vtanh.f32 %v159_v15  ;;  %v397_v19 = vmul.f32 -1.442695, %v159_v15 }
  0x99   :  { %431 = vpow2.f32 %v397_v19 }
  0x9c   :  { %v160_v16 = vpop.f32.mrf.mxu2 }
  0x9d   :  { %v430_v17 = vpop.eup %429 }
  0x9e   :  { %189 = vrot.lane.b32.xlu0 %v430_v17, %s521_s3 }
  0x9f   :  { %v432_v20 = vpop.eup %431 }
  0xa0   :  { %v165_v21 = vadd.f32 1.0, %v432_v20 }
  0xa2   :  { %433 = vrcp.f32 %v165_v21  ;;  %v177_v27 = vand.u32 2147483648, %v165_v21  ;;  %vm171_vm3 = vweird.f32 %v165_v21  ;;  %v175_v28 = vand.u32 2147483647, %v165_v21 }
  0xa4   :  { %v178_v30 = vor.u32 1.1754944e-38, %v177_v27  ;;  %vm176_vm5 = vcmp.eq.f32.partialorder %v175_v28, 8.507059e+37 }
  0xa6   :  { %184 = vrot.lane.b32.xlu0 %v182_v18, %s522_s28 }
  0xa8   :  { %v434_v22 = vpop.eup %433 }
  0xa9   :  { %v167_v23 = vmul.f32 %v434_v22, %v165_v21  ;;  %vm172_vm2 = vweird.f32 %v434_v22 }
  0xaa   :  { %vm173_vm4 = vmor %vm171_vm3, %vm172_vm2 }
  0xab   :  { %v168_v24 = vsub.f32 1.0, %v167_v23 }
  0xad   :  { %v169_v25 = vmul.f32 %v434_v22, %v168_v24 }
  0xae   :  { %273 = vrot.lane.b32.xlu0 %v408_v34, %s522_s28 }
  0xaf   :  { %v170_v26 = vadd.f32 %v434_v22, %v169_v25 }
  0xb1   :  { %v174_v29 = vsel %vm173_vm4, %v434_v22, %v170_v26 }
  0xb2   :  { %v179_v32 = vsel %vm176_vm5, %v178_v30, %v174_v29 }
 0x110   :  { %v190_v31 = vpop.permute.xlu0 %189 }
 0x111   :  { %v192_v33 = vmul.f32 %v190_v31, %v179_v32 }
 0x113   :  { %194 = vrot.lane.b32.xlu1 %v192_v33, %s522_s28 }
 0x118   :  { %v185_v35 = vpop.permute.xlu0 %184 }
 0x119   :  { %v187_v36 = vmul.f32 %v185_v35, %v179_v32 }
 0x120   :  { %v274_v50 = vpop.permute.xlu0 %273 }
 0x185   :  { %v195_v37 = vpop.permute.xlu1 %194 }
 0x186   :  { %v617_v38 = vadd.f32 %v195_v37, %v187_v36 }
 0x188   :  { %435 = vtanh.f32 %v617_v38 }
 0x18e   :  { %v436_v39 = vpop.eup %435 }
 0x18f   :  { %200 = vrot.lane.b32.xlu1 %v436_v39, %s521_s3 }
 0x201   :  { %v201_v46 = vpop.permute.xlu1 %200 }
 0x202   :  { %v203_v47 = vmul.f32 %v201_v46, %v179_v32 }
 0x204   :  { %205 = vrot.lane.b32.xlu0 %v203_v47, %s522_s28  ;;  %v218_v48 = vpack.c.bf16 %v203_v47, %v203_v47 }
 0x206   :  { %220 = vrot.lane.b32.xlu2 %v218_v48, %s522_s28 }
 0x260   :  { %v221_v49 = vpop.permute.xlu2 %220 }
 0x261   :  { %406 = vmatmul.msk.bf16.vlgmr.msra.gmra.mxu3 %vm56_vm0, %v221_v49 }
 0x276   :  { %v206_v53 = vpop.permute.xlu0 %205 }
 0x277   :  { %208 = vst.msk [vmem:[#allocation4] sm:$0xff] %vm56_vm0, %v206_v53 }
 0x2e4   :  { %v246_v56 = vpop.f32.mrf.mxu3 }
 0x2e5   :  { %v247_v57 = vadd.f32 %v246_v56, %v108_v55 }
 0x2e7   :  { %437 = vtanh.f32 %v247_v57  ;;  %v407_v60 = vmul.f32 -1.442695, %v247_v57 }
 0x2e9   :  { %439 = vpow2.f32 %v407_v60 }
 0x2ec   :  { %v248_v58 = vpop.f32.mrf.mxu3 }
 0x2ed   :  { %v438_v59 = vpop.eup %437 }
 0x2ee   :  { %278 = vrot.lane.b32.xlu2 %v438_v59, %s521_s3 }
 0x2ef   :  { %v440_v61 = vpop.eup %439 }
 0x2f0   :  { %v253_v62 = vadd.f32 1.0, %v440_v61 }
 0x2f2   :  { %441 = vrcp.f32 %v253_v62  ;;  %v265_v4 = vand.u32 2147483648, %v253_v62  ;;  %vm259_vm7 = vweird.f32 %v253_v62  ;;  %v263_v5 = vand.u32 2147483647, %v253_v62 }
 0x2f4   :  { %v266_v7 = vor.u32 1.1754944e-38, %v265_v4  ;;  %vm264_vm9 = vcmp.eq.f32.partialorder %v263_v5, 8.507059e+37 }
 0x2f8   :  { %v442_v63 = vpop.eup %441 }
 0x2f9   :  { %v255_v0 = vmul.f32 %v442_v63, %v253_v62  ;;  %vm260_vm6 = vweird.f32 %v442_v63 }
 0x2fa   :  { %vm261_vm8 = vmor %vm259_vm7, %vm260_vm6 }
 0x2fb   :  { %v256_v1 = vsub.f32 1.0, %v255_v0 }
 0x2fd   :  { %v257_v2 = vmul.f32 %v442_v63, %v256_v1 }
 0x2ff   :  { %v258_v3 = vadd.f32 %v442_v63, %v257_v2 }
 0x301   :  { %v262_v6 = vsel %vm261_vm8, %v442_v63, %v258_v3 }
 0x302   :  { %v267_v9 = vsel %vm264_vm9, %v266_v7, %v262_v6 }
 0x303   :  { %v276_v11 = vmul.f32 %v274_v50, %v267_v9 }
 0x348   :  { %v279_v8 = vpop.permute.xlu2 %278 }
 0x349   :  { %v281_v10 = vmul.f32 %v279_v8, %v267_v9 }
 0x34b   :  { %283 = vrot.lane.b32.xlu1 %v281_v10, %s522_s28 }
 0x3bd   :  { %v284_v12 = vpop.permute.xlu1 %283 }
 0x3be   :  { %v286_v13 = vadd.f32 %v284_v12, %v276_v11 }
 0x3c0   :  { %443 = vtanh.f32 %v286_v13  ;;  %300 = vrot.lane.b32.xlu0 %v286_v13, %s523_s5 }
 0x3c6   :  { %v444_v14 = vpop.eup %443 }
 0x3c7   :  { %289 = vrot.lane.b32.xlu2 %v444_v14, %s521_s3  ;;  %s313_s3 = sshll.u32 %s669_s7, 4  ;;  %s314_s3 = int_to_ptr.hbm [resolvable:$true] %s313_s3 }
 0x3cf   :  { %210 = vrot.lane.b32.xlu2 %v617_v38, %s523_s5 }
 0x421   :  { %v290_v15 = vpop.permute.xlu2 %289 }
 0x422   :  { %v292_v16 = vmul.f32 %v290_v15, %v267_v9 }
 0x424   :  { %294 = vrot.lane.b32.xlu1 %v292_v16, %s522_s28 }
 0x429   :  { %v211_v17 = vpop.permute.xlu2 %210 }
 0x42a   :  { %213 = vst.msk [vmem:[#allocation6] sm:$0xff] %vm56_vm0, %v211_v17 }
 0x432   :  { %v301_v18 = vpop.permute.xlu0 %300 }
 0x433   :  { %304 = vst.msk [vmem:[#allocation6 + $0x8] sm:$0xff] %vm56_vm0, %v301_v18 }
 0x496   :  { %v295_v19 = vpop.permute.xlu1 %294 }
 0x497   :  { %298 = vst.msk [vmem:[#allocation4 + $0x8] sm:$0xff] %vm56_vm0, %v295_v19 }
 0x498   :  { %305 = vst.msk [vmem:[#allocation2] sm:$0xff] %vm56_vm0, %v295_v19  ;;  %329 = dma.vmem_to_hbm [thread:$0]  %s322_s19, 256, %s324_s22, [#allocation5], %s527_s8, %s527_s8, %s528_s10  }
 0x499   :  { %316 = dma.vmem_to_hbm [thread:$0]  %s312_s24, 128, %s314_s3, [#allocation3]  }
 0x49a   :  { %342 = dma.vmem_to_hbm [thread:$0]  %s335_s27, 256, %s337_s30, [#allocation5], %s527_s8, %s527_s8, %s528_s10  }
 0x49b   :  { %517 = dma.done.wait [#allocation3], 128  }
 0x49c   :  { %518 = vsyncadd [#allocation3], 4294967168 }
 0x49d   :  { %519 = dma.done.wait [#allocation5], 512  }
 0x49e   :  { %520 = vsyncadd [#allocation5], 4294966784 }
 0x49f   :  { %355 = vsyncpa [#allocation3], 1 }
 0x4a0   :  { %356 = vsyncpa [#allocation5], 1 }

</bundles_post_ra>
